<compile_context>
chip_gen: v7x
topology: tpu7x:2x2x1
jax: 0.10.0
libtpu: 0.0.40
codegen_flags: <defaults>
</compile_context>

<pallas_src>
import jax
import jax.numpy as jnp
from jax.experimental import pallas as pl
from jax.experimental.pallas import tpu as pltpu


def _model_kernel(x1_ref, x2_ref, w_ref, b_ref, out_ref):
    # x1_ref: (4,) f32 SMEM  -- x1 row-major (1,2,2)
    # x2_ref: (4,) f32 SMEM  -- x2 row-major (1,2,2)
    # w_ref:  (4,) f32 SMEM  -- Linear(2,2) weight, row-major (2,2)
    # b_ref:  (2,) f32 SMEM  -- Linear(2,2) bias
    # out_ref:(1,) f32 SMEM
    x1_00 = x1_ref[0]
    x1_01 = x1_ref[1]
    x1_10 = x1_ref[2]
    x1_11 = x1_ref[3]

    x2_00 = x2_ref[0]   # x2[0,0,0]
    x2_01 = x2_ref[1]   # x2[0,0,1]
    x2_10 = x2_ref[2]   # x2[0,1,0]
    x2_11 = x2_ref[3]   # x2[0,1,1]

    w00 = w_ref[0]
    w01 = w_ref[1]
    w10 = w_ref[2]
    w11 = w_ref[3]

    b0 = b_ref[0]
    b1 = b_ref[1]

    # v2[0, i, k] = sum_j W[k, j] * x2[0, j, i] + b[k]   (permute folded in)
    t00 = w00 * x2_00 + w01 * x2_10 + b0   # i=0, k=0
    t01 = w10 * x2_00 + w11 * x2_10 + b1   # i=0, k=1
    t10 = w00 * x2_01 + w01 * x2_11 + b0   # i=1, k=0
    t11 = w10 * x2_01 + w11 * x2_11 + b1   # i=1, k=1

    zero = jnp.float32(0.0)
    relu_sum = (jnp.maximum(t00, zero) + jnp.maximum(t01, zero)
                + jnp.maximum(t10, zero) + jnp.maximum(t11, zero))

    # y = sum(x1 + relu(v2)) == sum(x1) + sum(relu(v2))  (full reduction)
    out_ref[0] = (x1_00 + x1_01 + x1_10 + x1_11) + relu_sum


@jax.jit
def model_forward(x1, x2, w, b):
    # Four flat SMEM operands (reshape is metadata-only; no concat kernel,
    # no extra HBM round-trip).  Returns a (1,) f32 device array.
    smem_spec = pl.BlockSpec(memory_space=pltpu.MemorySpace.SMEM)
    out = pl.pallas_call(
        _model_kernel,
        out_shape=jax.ShapeDtypeStruct((1,), jnp.float32),
        in_specs=[smem_spec, smem_spec, smem_spec, smem_spec],
        out_specs=smem_spec,
    )(x1.reshape(-1), x2.reshape(-1), w.reshape(-1), b.reshape(-1))
    return out


def reference_forward(x1, x2, w, b):
    v1 = jnp.transpose(x2, (0, 2, 1))
    v2 = jnp.einsum("bij,kj->bik", v1, w) + b
    r = jnp.maximum(v2, 0.0)
    return jnp.sum(x1 + r)


if __name__ == "__main__":
    key = jax.random.PRNGKey(0)
    k1, k2, kw, kb, kw2, kb2 = jax.random.split(key, 6)

    # Inputs (same shapes as the PyTorch module: (1, 2, 2))
    x1 = jax.random.normal(k1, (1, 2, 2), dtype=jnp.float32)
    x2 = jax.random.normal(k2, (1, 2, 2), dtype=jnp.float32)

    # Deterministic "Linear(2, 2)" params (PyTorch-style uniform init bound)
    bound = 1.0 / (2.0 ** 0.5)
    w = jax.random.uniform(kw, (2, 2), minval=-bound, maxval=bound, dtype=jnp.float32)
    b = jax.random.uniform(kb, (2,), minval=-bound, maxval=bound, dtype=jnp.float32)
    # Linear(2, 1) params exist in __init__ but are unused in forward.
    w2 = jax.random.uniform(kw2, (1, 2), minval=-bound, maxval=bound, dtype=jnp.float32)
    b2 = jax.random.uniform(kb2, (1,), minval=-bound, maxval=bound, dtype=jnp.float32)

    y = model_forward(x1, x2, w, b)
    jax.block_until_ready(y)

    y_ref = reference_forward(x1, x2, w, b)
    assert jnp.allclose(y[0], y_ref, atol=1e-5, rtol=1e-5), (y, y_ref)

    print("KERNEL_OK")
</pallas_src>

<mosaic_0001>
module attributes {stable_mosaic.version = 11 : i64} {
  func.func @_model_kernel(%arg0: memref<4xf32, #tpu.memory_space<smem>>, %arg1: memref<4xf32, #tpu.memory_space<smem>>, %arg2: memref<4xf32, #tpu.memory_space<smem>>, %arg3: memref<2xf32, #tpu.memory_space<smem>>, %arg4: memref<1xf32, #tpu.memory_space<smem>>) attributes {dimension_semantics = [], scalar_prefetch = 0 : i64, scratch_operands = 0 : i64, tpu.core_type = #tpu.core_type<tc>} {
    %c0 = arith.constant 0 : index
    %0 = memref.load %arg0[%c0] : memref<4xf32, #tpu.memory_space<smem>>
    %c1 = arith.constant 1 : index
    %1 = memref.load %arg0[%c1] : memref<4xf32, #tpu.memory_space<smem>>
    %c2 = arith.constant 2 : index
    %2 = memref.load %arg0[%c2] : memref<4xf32, #tpu.memory_space<smem>>
    %c3 = arith.constant 3 : index
    %3 = memref.load %arg0[%c3] : memref<4xf32, #tpu.memory_space<smem>>
    %c0_0 = arith.constant 0 : index
    %4 = memref.load %arg1[%c0_0] : memref<4xf32, #tpu.memory_space<smem>>
    %c1_1 = arith.constant 1 : index
    %5 = memref.load %arg1[%c1_1] : memref<4xf32, #tpu.memory_space<smem>>
    %c2_2 = arith.constant 2 : index
    %6 = memref.load %arg1[%c2_2] : memref<4xf32, #tpu.memory_space<smem>>
    %c3_3 = arith.constant 3 : index
    %7 = memref.load %arg1[%c3_3] : memref<4xf32, #tpu.memory_space<smem>>
    %c0_4 = arith.constant 0 : index
    %8 = memref.load %arg2[%c0_4] : memref<4xf32, #tpu.memory_space<smem>>
    %c1_5 = arith.constant 1 : index
    %9 = memref.load %arg2[%c1_5] : memref<4xf32, #tpu.memory_space<smem>>
    %c2_6 = arith.constant 2 : index
    %10 = memref.load %arg2[%c2_6] : memref<4xf32, #tpu.memory_space<smem>>
    %c3_7 = arith.constant 3 : index
    %11 = memref.load %arg2[%c3_7] : memref<4xf32, #tpu.memory_space<smem>>
    %c0_8 = arith.constant 0 : index
    %12 = memref.load %arg3[%c0_8] : memref<2xf32, #tpu.memory_space<smem>>
    %c1_9 = arith.constant 1 : index
    %13 = memref.load %arg3[%c1_9] : memref<2xf32, #tpu.memory_space<smem>>
    %14 = arith.mulf %8, %4 : f32
    %15 = arith.mulf %9, %6 : f32
    %16 = arith.addf %14, %15 : f32
    %17 = arith.addf %16, %12 : f32
    %18 = arith.mulf %10, %4 : f32
    %19 = arith.mulf %11, %6 : f32
    %20 = arith.addf %18, %19 : f32
    %21 = arith.addf %20, %13 : f32
    %22 = arith.mulf %8, %5 : f32
    %23 = arith.mulf %9, %7 : f32
    %24 = arith.addf %22, %23 : f32
    %25 = arith.addf %24, %12 : f32
    %26 = arith.mulf %10, %5 : f32
    %27 = arith.mulf %11, %7 : f32
    %28 = arith.addf %26, %27 : f32
    %29 = arith.addf %28, %13 : f32
    %cst = arith.constant 0.000000e+00 : f32
    %30 = arith.maximumf %17, %cst : f32
    %cst_10 = arith.constant 0.000000e+00 : f32
    %31 = arith.maximumf %21, %cst_10 : f32
    %32 = arith.addf %30, %31 : f32
    %cst_11 = arith.constant 0.000000e+00 : f32
    %33 = arith.maximumf %25, %cst_11 : f32
    %34 = arith.addf %32, %33 : f32
    %cst_12 = arith.constant 0.000000e+00 : f32
    %35 = arith.maximumf %29, %cst_12 : f32
    %36 = arith.addf %34, %35 : f32
    %37 = arith.addf %0, %1 : f32
    %38 = arith.addf %37, %2 : f32
    %39 = arith.addf %38, %3 : f32
    %40 = arith.addf %39, %36 : f32
    %c0_13 = arith.constant 0 : index
    %41 = memref.load %arg4[%c0_13] : memref<1xf32, #tpu.memory_space<smem>>
    memref.store %40, %arg4[%c0_13] : memref<1xf32, #tpu.memory_space<smem>>
    return
  }
}

</mosaic_0001>

<bundles_post_ra>
// kernel: model_forward.1
= control target key start
LH: loop header
LB: loop body
LE: loop exit
PB: predicated region body
PF: predicated region fallthrough
CT: control target
= control target key end

     0   :  { %s265_s0 = inlined_call_operand.vmem [shape: f32[4], index: 0, kind: input, shape index: {}]   ;;  %s266_s1 = inlined_call_operand.vmem [shape: f32[4], index: 1, kind: input, shape index: {}]   ;;  %s267_s2 = inlined_call_operand.vmem [shape: f32[4], index: 2, kind: input, shape index: {}]   ;;  %s268_s3 = inlined_call_operand.vmem [shape: f32[2], index: 3, kind: input, shape index: {}]   ;;  %s269_s4 = inlined_call_operand.hbm [shape: f32[1], index: 4, kind: output, shape index: {}]  }
   0x1   :  { %271 = sst [smem:[#allocation15_spill]] %s269_s4 }
   0x2   :  { %9 = vsyncpa [#allocation4], 0 }
   0x3   :  { %10 = vsyncpa [#allocation6], 0 }
   0x4   :  { %11 = vsyncpa [#allocation9], 0  ;;  %s29_s17 = sshll.u32 %s266_s1, 4  ;;  %s30_s17 = int_to_ptr.vmem [resolvable:$true] %s29_s17 }
   0x5   :  { %12 = vsyncpa [#allocation3], 0  ;;  %s19_s20 = sshll.u32 %s265_s0, 4  ;;  %s141_s21 = scalar_lea.vmem %s30_s17, 16  ;;  %s20_s20 = int_to_ptr.vmem [resolvable:$true] %s19_s20 }
   0x6   :  { %p142_p0 = scmp.ne.s32.totalorder %s30_s17, %s141_s21  ;;  %p146_p1 = scmp.lt.s32.totalorder %s30_s17, %s30_s17 }
   0x7   :  { %p147_p2 = scmp.lt.s32.totalorder %s141_s21, %s141_s21 }
   0x9   :  { %p148_p3 = por %p147_p2, %p146_p1 }
   0xb   :  { %p149_p4 = pnand %p148_p3, %p142_p0 }
   0xd   :  { %152 = shalt.err (!%p149_p4)
}
   0xe   :  { %s207_s22 = smov [#allocation5]   ;;  %s153_s23 = scalar_lea.vmem %s20_s20, 16 }
   0xf   :  { %32 = dma.vmem_to_smem %s30_s17, 16, %s207_s22, [#allocation6]  }
  0x10   :  { %p154_p5 = scmp.ne.s32.totalorder %s20_s20, %s153_s23  ;;  %p158_p6 = scmp.lt.s32.totalorder %s20_s20, %s20_s20 }
  0x11   :  { %p159_p7 = scmp.lt.s32.totalorder %s153_s23, %s153_s23 }
  0x13   :  { %p160_p8 = por %p159_p7, %p158_p6 }
  0x15   :  { %p161_p9 = pnand %p160_p8, %p154_p5 }
  0x17   :  { %164 = shalt.err (!%p161_p9)
}
  0x18   :  { %s208_s1 = smov [#allocation2]   ;;  %s39_s25 = sshll.u32 %s267_s2, 4  ;;  %s40_s25 = int_to_ptr.vmem [resolvable:$true] %s39_s25 }
  0x19   :  { %22 = dma.vmem_to_smem %s20_s20, 16, %s208_s1, [#allocation4]  }
  0x1a   :  { %s49_s28 = sshll.u32 %s268_s3, 4  ;;  %s165_s29 = scalar_lea.vmem %s40_s25, 16  ;;  %s50_s28 = int_to_ptr.vmem [resolvable:$true] %s49_s28 }
  0x1b   :  { %p166_p10 = scmp.ne.s32.totalorder %s40_s25, %s165_s29  ;;  %p170_p11 = scmp.lt.s32.totalorder %s40_s25, %s40_s25 }
  0x1c   :  { %p171_p12 = scmp.lt.s32.totalorder %s165_s29, %s165_s29 }
  0x1e   :  { %p172_p13 = por %p171_p12, %p170_p11 }
  0x20   :  { %p173_p0 = pnand %p172_p13, %p166_p10 }
  0x22   :  { %176 = shalt.err (!%p173_p0)
}
  0x23   :  { %s209_s30 = smov [#allocation7]   ;;  %s177_s5 = scalar_lea.vmem %s50_s28, 16 }
  0x24   :  { %42 = dma.vmem_to_smem %s40_s25, 16, %s209_s30, [#allocation6]  }
  0x25   :  { %p178_p1 = scmp.ne.s32.totalorder %s50_s28, %s177_s5  ;;  %p182_p2 = scmp.lt.s32.totalorder %s50_s28, %s50_s28 }
  0x26   :  { %p183_p3 = scmp.lt.s32.totalorder %s177_s5, %s177_s5 }
  0x28   :  { %p184_p4 = por %p183_p3, %p182_p2 }
  0x2a   :  { %p185_p5 = pnand %p184_p4, %p178_p1 }
  0x2c   :  { %188 = shalt.err (!%p185_p5)
}
  0x2d   :  { %s210_s2 = smov [#allocation8]  }
  0x2e   :  { %52 = dma.vmem_to_smem %s50_s28, 16, %s210_s2, [#allocation9]  }
  0x2f   :  { %199 = dma.done.wait [#allocation4], 16  }
  0x30   :  { %200 = vsyncadd [#allocation4], 4294967280 }
  0x31   :  { %201 = dma.done.wait [#allocation6], 32  }
  0x32   :  { %202 = vsyncadd [#allocation6], 4294967264 }
  0x33   :  { %203 = dma.done.wait [#allocation9], 16  }
  0x34   :  { %204 = vsyncadd [#allocation9], 4294967280 }
  0x35   :  { %65 = sfence }
  0x36   :  { %s66_s3 = sld [smem:[#allocation2]]  ;;  %s125_s6 = sld [smem:[#allocation2 + $0x1]] }
  0x37   :  { %s126_s7 = sld [smem:[#allocation2 + $0x2]]  ;;  %s70_s8 = sld [smem:[#allocation5]] }
  0x38   :  { %s250_s9 = sld [smem:[#allocation2 + $0x3]]  ;;  %s129_s10 = sld [smem:[#allocation5 + $0x2]] }
  0x39   :  { %s74_s11 = sld [smem:[#allocation7]]  ;;  %s131_s12 = sld [smem:[#allocation7 + $0x1]] }
  0x3a   :  { %s132_s13 = sld [smem:[#allocation7 + $0x2]]  ;;  %s133_s14 = sld [smem:[#allocation7 + $0x3]] }
  0x3b   :  { %s128_s15 = sld [smem:[#allocation5 + $0x1]]  ;;  %s130_s16 = sld [smem:[#allocation5 + $0x3]] }
  0x3c   :  { %s78_s17 = sld [smem:[#allocation8]]  ;;  %s103_s18 = sadd.f32 %s125_s6, %s66_s3 }
  0x3d   :  { %s134_s19 = sld [smem:[#allocation8 + $0x1]]  ;;  %s211_s4 = smov 0.0  }
  0x3e   :  { %s104_s21 = sadd.f32 %s126_s7, %s103_s18 }
  0x3f   :  { %s80_s20 = smul.f32 %s74_s11, %s70_s8 }
  0x40   :  { %s81_s22 = smul.f32 %s131_s12, %s129_s10  ;;  %s105_s25 = sadd.f32 %s250_s9, %s104_s21 }
  0x41   :  { %s84_s23 = smul.f32 %s132_s13, %s70_s8 }
  0x42   :  { %s82_s1 = sadd.f32 %s81_s22, %s80_s20  ;;  %s85_s0 = smul.f32 %s133_s14, %s129_s10 }
  0x43   :  { %s88_s24 = smul.f32 %s128_s15, %s74_s11 }
  0x44   :  { %s83_s26 = sadd.f32 %s82_s1, %s78_s17  ;;  %s89_s27 = smul.f32 %s131_s12, %s130_s16 }
  0x45   :  { %s86_s28 = sadd.f32 %s85_s0, %s84_s23  ;;  %s92_s29 = smul.f32 %s132_s13, %s128_s15 }
  0x46   :  { %s90_s30 = sadd.f32 %s89_s27, %s88_s24  ;;  %s93_s5 = smul.f32 %s133_s14, %s130_s16 }
  0x47   :  { %s87_s2 = sadd.f32 %s134_s19, %s86_s28  ;;  %s96_s3 = smax.f32 %s211_s4, %s83_s26 }
  0x48   :  { %s91_s6 = sadd.f32 %s90_s30, %s78_s17  ;;  %s272_s23 = sld [smem:[#allocation15_spill]] }
  0x49   :  { %s94_s7 = sadd.f32 %s93_s5, %s92_s29  ;;  %s97_s18 = smax.f32 %s211_s4, %s87_s2 }
  0x4a   :  { %s98_s8 = sadd.f32 %s97_s18, %s96_s3  ;;  %s99_s20 = smax.f32 %s211_s4, %s91_s6 }
  0x4b   :  { %s95_s22 = sadd.f32 %s134_s19, %s94_s7 }
  0x4c   :  { %s100_s10 = sadd.f32 %s99_s20, %s98_s8 }
  0x4d   :  { %s101_s11 = smax.f32 %s211_s4, %s95_s22 }
  0x4e   :  { %s102_s9 = sadd.f32 %s101_s11, %s100_s10  ;;  %s189_s13 = scalar_lea.hbm %s272_s23, 16 }
  0x4f   :  { %p190_p6 = scmp.ne.s32.totalorder %s272_s23, %s189_s13  ;;  %p193_p7 = scmp.lt.u32.totalorder %s189_s13, %s272_s23 }
  0x50   :  { %s106_s21 = sadd.f32 %s105_s25, %s102_s9 }
  0x51   :  { %p195_p8 = pnand %p193_p7, %p190_p6 }
  0x52   :  { %108 = sst [smem:[#allocation10]] %s106_s21 }
  0x53   :  { %198 = shalt.err (!%p195_p8)
}
  0x54   :  { %s212_s19 = smov [#allocation10]  }
  0x55   :  { %116 = dma.smem_to_hbm %s212_s19, 16, %s272_s23, [#allocation3]  }
  0x56   :  { %205 = dma.done.wait [#allocation3], 16  }
  0x57   :  { %206 = vsyncadd [#allocation3], 4294967280 }
  0x58   :  { %120 = sfence }
  0x59   :  { %121 = vsyncpa [#allocation3], 1 }
  0x5a   :  { %122 = vsyncpa [#allocation4], 1 }
  0x5b   :  { %123 = vsyncpa [#allocation6], 1 }
  0x5c   :  { %124 = vsyncpa [#allocation9], 1 }

</bundles_post_ra>
